<compile_context>
chip_gen: v6e
topology: v6e:2x2x1
jax: 0.10.0
libtpu: 0.0.40
codegen_flags: <defaults>
</compile_context>

<pallas_src>
import functools

import jax
import jax.numpy as jnp
from jax.experimental import pallas as pl
from jax.experimental.pallas import tpu as pltpu


def _round_up(x, m):
    return ((x + m - 1) // m) * m


def _vmem_budget_bytes():
    """Per-generation scoped-VMEM budget (~75% of physical VMEM per TensorCore)."""
    try:
        cap = int(pltpu.get_tpu_info().vmem_capacity_bytes)
    except Exception:
        cap = 64 * 1024 * 1024  # v7x has the smallest physical VMEM -> safe fallback
    return (cap * 3) // 4


def _ols_kernel(logits_ref, labels_ref, weights_ref, out_ref, *, n_rows, tile_n):
    """One (tile_n, C) logits tile -> one per-tile partial loss sum."""
    i = pl.program_id(0)

    x = logits_ref[...].astype(jnp.float32)            # (TN, C) f32
    y = labels_ref[...]                                 # (TN, 1) int32
    w = weights_ref[...]                                 # (C, C)  bf16 (single-buffered)

    # stable log-sum-exp along classes (lane axis); logp is never materialized
    z = x - jnp.max(x, axis=-1, keepdims=True)                       # (TN, C)
    lse = jnp.log(jnp.sum(jnp.exp(z), axis=-1, keepdims=True))       # (TN, 1)

    # one-hot labels built directly in the MXU operand dtype (0/1 exact in bf16)
    cls = jax.lax.broadcasted_iota(jnp.int32, x.shape, 1)
    onehot = (cls == y).astype(w.dtype)                              # (TN, C)

    # weighted[n, c] = W[c, y[n]] = alpha*[c==y[n]] + (1-alpha)*supervise[c, y[n]]
    # bf16 x bf16 -> f32 MXU contraction on axis 1 of BOTH operands (no XLU transpose)
    weighted = jax.lax.dot_general(
        onehot, w, (((1,), (1,)), ((), ())),
        preferred_element_type=jnp.float32)                          # (TN, C) f32

    # row_loss = -sum_c weighted * logp = -sum_c weighted*(z - lse)
    #          = lse * sum_c(weighted) - sum_c(weighted * z)
    # (sum_c(weighted) ~= 1; keeping it compensates bf16 rounding of W's columns)
    s = jnp.sum(weighted * z, axis=-1, keepdims=True)                # (TN, 1)
    wsum = jnp.sum(weighted, axis=-1, keepdims=True)                 # (TN, 1)
    row_loss = wsum * lse - s                                        # (TN, 1)

    # mask zero-padded rows of the last (partial) tile so the mean is unbiased
    row_idx = i * tile_n + jax.lax.broadcasted_iota(jnp.int32, row_loss.shape, 0)
    row_loss = jnp.where(row_idx < n_rows, row_loss, 0.0)

    # per-tile partial sum, stored as a full lane-dense (1, 8, 128) block
    tile_sum = jnp.sum(row_loss)
    out_ref[...] = jnp.broadcast_to(tile_sum, out_ref.shape).astype(jnp.float32)


def fold_weights(supervise, alpha, dtype=jnp.bfloat16):
    """Fold alpha*CE + (1-alpha)*soft into ONE matrix. Compute once per supervise update."""
    c = supervise.shape[0]
    w = (alpha * jnp.eye(c, dtype=jnp.float32)
         + (1.0 - alpha) * supervise.astype(jnp.float32))
    return w.astype(dtype)


def online_label_smoothing_loss(y_h, y, weights, *, tile_n=1024):
    """y_h: (N, C) logits (f32/bf16), y: (N,) int labels, weights: (C, C) folded matrix."""
    n, c = y_h.shape
    assert weights.shape == (c, c)

    logit_bytes = jnp.dtype(y_h.dtype).itemsize
    pack = {4: 8, 2: 16, 1: 32}.get(logit_bytes, 8)     # sublane packing per dtype
    w_bytes = c * c * jnp.dtype(weights.dtype).itemsize  # single-buffered weights

    # Pick the largest batch tile that fits the per-generation VMEM budget.
    budget = _vmem_budget_bytes()
    tn = max(pack, min(_round_up(int(tile_n), pack), _round_up(n, pack)))

    def footprint(t):
        logits_buf = 2 * t * c * logit_bytes             # double-buffered logits tile
        labels_buf = 2 * t * 4                           # double-buffered labels tile
        out_buf = 2 * 8 * 128 * 4                        # double-buffered output block
        temps = 4 * t * c * 4                            # f32 in-kernel temporaries (headroom)
        return logits_buf + labels_buf + w_bytes + out_buf + temps

    while tn > pack and footprint(tn) > budget:
        tn = max(pack, _round_up(tn // 2, pack))

    n_pad = _round_up(n, tn)
    num_tiles = n_pad // tn

    labels = y.astype(jnp.int32).reshape(n, 1)
    if n_pad != n:
        y_h = jnp.pad(y_h, ((0, n_pad - n), (0, 0)))
        labels = jnp.pad(labels, ((0, n_pad - n), (0, 0)))

    kernel = functools.partial(_ols_kernel, n_rows=n, tile_n=tn)
    partial_sums = pl.pallas_call(
        kernel,
        out_shape=jax.ShapeDtypeStruct((num_tiles, 8, 128), jnp.float32),
        grid_spec=pltpu.PrefetchScalarGridSpec(
            num_scalar_prefetch=0,
            grid=(num_tiles,),
            in_specs=[
                pl.BlockSpec((tn, c), lambda i: (i, 0)),      # streamed logits
                pl.BlockSpec((tn, 1), lambda i: (i, 0)),      # streamed labels
                pl.BlockSpec((c, c), lambda i: (0, 0),        # resident weights,
                             pipeline_mode=pl.Buffered(1)),   # single-buffered (constant)
            ],
            out_specs=pl.BlockSpec((1, 8, 128), lambda i: (i, 0, 0)),  # per-tile partial
        ),
        compiler_params=pltpu.CompilerParams(
            dimension_semantics=("parallel",),                # independent per-tile partials
            vmem_limit_bytes=int(budget),                     # derived per generation
        ),
    )(y_h, labels, weights)

    # Final reduction + unbiased mean in the wrapper. This keeps the grid axis
    # parallel (both v7x TensorCores) and the cross-tile accumulation exact in f32.
    return jnp.sum(partial_sums[:, 0, 0]) * (1.0 / n)


def make_supervise(n_classes, smoothing):
    """Deterministic init matching the PyTorch buffer construction."""
    off = smoothing / (n_classes - 1)
    sup = jnp.full((n_classes, n_classes), off, dtype=jnp.float32)
    sup = sup.at[jnp.arange(n_classes), jnp.arange(n_classes)].set(1.0 - smoothing)
    return sup


def reference_loss(y_h, y, supervise, alpha):
    logp = jax.nn.log_softmax(y_h.astype(jnp.float32), axis=-1)
    true_dist = supervise[:, y].T                     # (N, C)
    soft = jnp.mean(jnp.sum(-true_dist * logp, axis=-1))
    hard = jnp.mean(-logp[jnp.arange(y.shape[0]), y])
    return alpha * hard + (1.0 - alpha) * soft


def reference_loss_folded(y_h, y, weights):
    logp = jax.nn.log_softmax(y_h.astype(jnp.float32), axis=-1)
    w = weights.astype(jnp.float32)
    return jnp.mean(jnp.sum(-w[:, y].T * logp, axis=-1))


if __name__ == "__main__":
    alpha = 0.5
    n_classes = 16
    smoothing = 0.1
    batch = 20  # not a multiple of the tile -> exercises padding + masking

    key = jax.random.PRNGKey(0)
    k1, k2 = jax.random.split(key)
    # bf16 logits (halves HBM traffic); kernel upcasts to f32 internally
    y_h = jax.random.normal(k1, (batch, n_classes), dtype=jnp.float32).astype(jnp.bfloat16)
    y = jax.random.randint(k2, (batch,), 0, n_classes, dtype=jnp.int32)

    supervise = make_supervise(n_classes, smoothing)
    # Fold alpha*CE + (1-alpha)*soft into ONE bf16 MXU weight matrix, once (hoisted).
    weights = fold_weights(supervise, alpha, dtype=jnp.bfloat16)

    # tile_n=16 -> 2-step grid (1 full bf16-packed tile + 1 partial) on the small demo
    loss = online_label_smoothing_loss(y_h, y, weights, tile_n=16)
    loss = jax.block_until_ready(loss)

    # tight check: identical (bf16-rounded) folded weights, f32 math
    ref_tight = reference_loss_folded(y_h, y, weights)
    assert jnp.allclose(loss, ref_tight, rtol=1e-4, atol=1e-4), (loss, ref_tight)

    # semantic check vs the PyTorch-style f32 supervise matrix (bf16 W rounding ~0.4%)
    ref = reference_loss(y_h, y, supervise, alpha)
    assert jnp.allclose(loss, ref, rtol=2e-2, atol=2e-2), (loss, ref)

    print("KERNEL_OK")
</pallas_src>

<mosaic_0001>
module attributes {stable_mosaic.version = 11 : i64} {
  func.func @_ols_kernel(%arg0: i32, %arg1: memref<16x16xbf16, #tpu.memory_space<vmem>>, %arg2: memref<16x1xi32, #tpu.memory_space<vmem>>, %arg3: memref<16x16xbf16, #tpu.memory_space<vmem>>, %arg4: memref<1x8x128xf32, #tpu.memory_space<vmem>>) attributes {dimension_semantics = [#tpu.dimension_semantics<parallel>], iteration_bounds = array<i64: 2>, scalar_prefetch = 0 : i64, scratch_operands = 0 : i64, tpu.core_type = #tpu.core_type<tc>, window_params = [{transform_indices = @transform_0, window_bounds = array<i64: 16, 16>}, {transform_indices = @transform_1, window_bounds = array<i64: 16, 1>}, {pipeline_mode = #tpu.pipeline_mode<synchronous>, transform_indices = @transform_2, window_bounds = array<i64: 16, 16>}, {transform_indices = @transform_3, window_bounds = array<i64: 1, 8, 128>}]} {
    %c0 = arith.constant 0 : index
    %c0_0 = arith.constant 0 : index
    %0 = vector.load %arg1[%c0, %c0_0] : memref<16x16xbf16, #tpu.memory_space<vmem>>, vector<16x16xbf16>
    %1 = arith.extf %0 : vector<16x16xbf16> to vector<16x16xf32>
    %c0_1 = arith.constant 0 : index
    %c0_2 = arith.constant 0 : index
    %2 = vector.load %arg2[%c0_1, %c0_2] : memref<16x1xi32, #tpu.memory_space<vmem>>, vector<16x1xi32>
    %c0_3 = arith.constant 0 : index
    %c0_4 = arith.constant 0 : index
    %3 = vector.load %arg3[%c0_3, %c0_4] : memref<16x16xbf16, #tpu.memory_space<vmem>>, vector<16x16xbf16>
    %cst = arith.constant dense<0xFF800000> : vector<16xf32>
    %4 = vector.multi_reduction <maximumf>, %1, %cst [1] : vector<16x16xf32> to vector<16xf32>
    %5 = vector.shape_cast %4 : vector<16xf32> to vector<16x1xf32>
    %6 = vector.broadcast %5 : vector<16x1xf32> to vector<16x16xf32>
    %7 = arith.subf %1, %6 : vector<16x16xf32>
    %8 = math.exp %7 : vector<16x16xf32>
    %cst_5 = arith.constant dense<0.000000e+00> : vector<16xf32>
    %9 = vector.multi_reduction <add>, %8, %cst_5 [1] : vector<16x16xf32> to vector<16xf32>
    %10 = vector.shape_cast %9 : vector<16xf32> to vector<16x1xf32>
    %11 = math.log %10 : vector<16x1xf32>
    %12 = tpu.iota {dimensions = array<i32: 1>} : vector<16x16xi32>
    %13 = vector.broadcast %2 : vector<16x1xi32> to vector<16x16xi32>
    %14 = arith.cmpi eq, %12, %13 : vector<16x16xi32>
    %15 = arith.extui %14 : vector<16x16xi1> to vector<16x16xi32>
    %16 = arith.sitofp %15 : vector<16x16xi32> to vector<16x16xf32>
    %17 = arith.truncf %16 : vector<16x16xf32> to vector<16x16xbf16>
    %cst_6 = arith.constant dense<0.000000e+00> : vector<16x16xf32>
    %18 = tpu.matmul %17, %3, %cst_6 {dimension_numbers = #tpu.dot_dimension_numbers<[1], [1], [0], [0], [0, 0, 1, 0], [], []>} : vector<16x16xbf16>, vector<16x16xbf16>, vector<16x16xf32> -> vector<16x16xf32>
    %19 = arith.mulf %18, %7 : vector<16x16xf32>
    %cst_7 = arith.constant dense<0.000000e+00> : vector<16xf32>
    %20 = vector.multi_reduction <add>, %19, %cst_7 [1] : vector<16x16xf32> to vector<16xf32>
    %21 = vector.shape_cast %20 : vector<16xf32> to vector<16x1xf32>
    %cst_8 = arith.constant dense<0.000000e+00> : vector<16xf32>
    %22 = vector.multi_reduction <add>, %18, %cst_8 [1] : vector<16x16xf32> to vector<16xf32>
    %23 = vector.shape_cast %22 : vector<16xf32> to vector<16x1xf32>
    %24 = arith.mulf %23, %11 : vector<16x1xf32>
    %25 = arith.subf %24, %21 : vector<16x1xf32>
    %c16_i32 = arith.constant 16 : i32
    %26 = arith.muli %arg0, %c16_i32 : i32
    %27 = tpu.iota {dimensions = array<i32: 0>} : vector<16x1xi32>
    %28 = vector.broadcast %26 : i32 to vector<16x1xi32>
    %29 = arith.addi %28, %27 : vector<16x1xi32>
    %c20_i32 = arith.constant 20 : i32
    %30 = vector.broadcast %c20_i32 : i32 to vector<16x1xi32>
    %31 = arith.cmpi slt, %29, %30 : vector<16x1xi32>
    %cst_9 = arith.constant 0.000000e+00 : f32
    %32 = vector.broadcast %cst_9 : f32 to vector<16x1xf32>
    %33 = arith.select %31, %25, %32 : vector<16x1xi1>, vector<16x1xf32>
    %34 = vector.shape_cast %33 : vector<16x1xf32> to vector<1x16x1xf32>
    %cst_10 = arith.constant dense<0.000000e+00> : vector<1xf32>
    %35 = vector.multi_reduction <add>, %34, %cst_10 [1, 2] : vector<1x16x1xf32> to vector<1xf32>
    %36 = vector.shape_cast %35 : vector<1xf32> to vector<1x1x1xf32>
    %37 = vector.extract %36[0, 0, 0] : f32 from vector<1x1x1xf32>
    %38 = vector.broadcast %37 : f32 to vector<1x8x128xf32>
    %c0_11 = arith.constant 0 : index
    %c0_12 = arith.constant 0 : index
    %c0_13 = arith.constant 0 : index
    %39 = vector.load %arg4[%c0_11, %c0_12, %c0_13] : memref<1x8x128xf32, #tpu.memory_space<vmem>>, vector<1x8x128xf32>
    tpu.vector_store %arg4[%c0_11, %c0_12, %c0_13], %38 {strides = array<i32>} : memref<1x8x128xf32, #tpu.memory_space<vmem>>, vector<1x8x128xf32>,
    return
  }
  func.func @transform_0(%arg0: i32) -> (i32, i32) {
    %c0_i32 = arith.constant 0 : i32
    %c0_i32_0 = arith.constant 0 : i32
    return %arg0, %c0_i32 : i32, i32
  }
  func.func @transform_1(%arg0: i32) -> (i32, i32) {
    %c0_i32 = arith.constant 0 : i32
    %c0_i32_0 = arith.constant 0 : i32
    return %arg0, %c0_i32 : i32, i32
  }
  func.func @transform_2(%arg0: i32) -> (i32, i32) {
    %c0_i32 = arith.constant 0 : i32
    %c0_i32_0 = arith.constant 0 : i32
    %c0_i32_1 = arith.constant 0 : i32
    return %c0_i32, %c0_i32_0 : i32, i32
  }
  func.func @transform_3(%arg0: i32) -> (i32, i32, i32) {
    %c0_i32 = arith.constant 0 : i32
    %c0_i32_0 = arith.constant 0 : i32
    %c0_i32_1 = arith.constant 0 : i32
    return %arg0, %c0_i32, %c0_i32_0 : i32, i32, i32
  }
}

</mosaic_0001>

<bundles_post_ra>
// kernel: tpu_custom_call.1
= control target key start
LH: loop header
LB: loop body
LE: loop exit
PB: predicated region body
PF: predicated region fallthrough
CT: control target
= control target key end

     0   :  { %8 = vsyncpa [#allocation3], 0  ;;  %s700_s0 = inlined_call_operand.vmem [shape: bf16[32,16], index: 0, kind: input, shape index: {}]   ;;  %s701_s1 = inlined_call_operand.vmem [shape: s32[32,1], index: 1, kind: input, shape index: {}]   ;;  %s702_s2 = inlined_call_operand.vmem [shape: bf16[16,16], index: 2, kind: input, shape index: {}]   ;;  %s703_s3 = inlined_call_operand.hbm [shape: f32[2,8,128], index: 3, kind: output, shape index: {}]  }
   0x1   :  { %10 = vsyncpa [#allocation3 + $0x1], 0  ;;  %s591_s12 = smov 0   ;;  %s593_s13 = smov 0  }
   0x2   :  { %s595_s14 = smov 0   ;;  %s597_s15 = smov 0  }
   0x3 LB: > { %s612_s16 = sadd.s32 4294967295, %s565_s15   ;;  %s421_s17 = sadd.s32 4294967294, %s565_s15   ;;  %s565_s15 = sphi %s597_s15, %s709_s15   ;;  %s561_s14 = sphi %s595_s14, %s708_s14   ;;  %s557_s13 = sphi %s593_s13, %s707_s13   ;;  %s553_s12 = sphi %s591_s12, %s706_s12  }
   0x4   : > { %s616_s18 = sadd.s32 1, %s565_s15   ;;  %s96_s19 = sadd.s32 1, %s561_s14 }
   0x5   : > { %s93_s20 = ssub.s32 %s565_s15, %s616_s18  ;;  %p106_p0 = scmp.ne.s32.totalorder %s561_s14, %s557_s13 }
   0x6   : > { %p94_p1 = scmp.eq.s32.totalorder %s93_s20, 0  ;;  %p107_p2 = scmp.eq.s32.totalorder %s612_s16, 1 }
   0x7   : > { %p112_p3 = scmp.ne.s32.totalorder %s557_s13, %s553_s12  ;;  %p113_p4 = scmp.eq.s32.totalorder %s421_s17, 1 }
   0x8   : > { %s627_s21 = scalar_select %p94_p1, %s561_s14, %s96_s19  }
   0x9   : > { %p629_p5 = por %p107_p2, %p106_p0  ;;  %p633_p6 = por %p113_p4, %p112_p3 }
   0xa   : > { %p424_p7 = scmp.ge.s32.totalorder %s565_s15, 1  ;;  %p152_p8 = scmp.lt.s32.totalorder %s565_s15, 3 }
   0xc   : > { %p153_p9 = pnand %p424_p7, %p152_p8 }
   0xd   : > { %s426_s24 = sshll.u32 (!%p153_p9), %s612_s16, 1  ;;  %s434_s8 = sshll.u32 (!%p153_p9), %s612_s16, 4 }
   0xe   : > { %156 = sbr.rel (%p153_p9) target bundleno = 719 (0x2cf), region = 32  ;;  %p182_p10 = scmp.lt.s32.totalorder (!%p153_p9), %s426_s24, 3 }
   0xf   : > { %s178_s9 = sand.u32 (!%p153_p9), 1, %s557_s13   ;;  %s436_s19 = sshll.u32 (!%p153_p9), %s612_s16, 7 }
  0x10   : > { %s425_s10 = sshll.u32 (!%p153_p9), %s178_s9, 3  ;;  %s348_s26 = scalar_lea.hbm (!%p153_p9), %s703_s3, %s436_s19 }
  0x11   : > { %s180_s11 = scalar_lea.vmem (!%p153_p9), [#allocation2], %s425_s10  ;;  %s570_s29 = smov (!%p153_p9), [#allocation2]  }
  0x12   : > { %s350_s17 = sshll.u32 (!%p153_p9), %s180_s11, 4  ;;  %s509_s16 = sshll.u32 (!%p153_p9), %s570_s29, 4  ;;  %s662_s17 = int_to_ptr.vmem [resolvable:$true] %s350_s17  ;;  %s510_s16 = int_to_ptr.vmem [resolvable:$false] %s509_s16 }
  0x13   : > { %v567_v0 = vmov 0   ;;  %v568_v1 = vmov 0.0   ;;  %v496_v2 = vld [vmem:[%s702_s2] sm:$0xff]   ;;  %s711_s24 = smov (!%p182_p10, %s426_s24), 3  ;;  %vm202_vm0 = vcmask 130048   ;;  %vm569_vm1 = vmmov 0   ;;  %p512_p0 = scmp.lt.s32.totalorder %s662_s17, %s510_s16 }
  0x14   : > { %495 = vset.pattern.permute.xlu0 %v567_v0  ;;  %445 = vmatprep.subr.bf16.mxu0 %v568_v1  ;;  %v249_v3 = vsel %vm202_vm0, %v496_v2, 0  ;;  %s429_s27 = sshll.u32 %s711_s24, 3  ;;  %s427_s4 = sshll.u32 %s711_s24, 2  ;;  %v225_v11 = vlaneseq  ;;  %v314_v44 = vstv %s434_s8  ;;  %vm321_vm6 = vcmask 7168  }
  0x15   : > { %446 = vmatpush3.bf16.xpose.msra.mxu0 %v249_v3  ;;  %s191_s30 = scalar_lea.vmem %s701_s1, %s429_s27  ;;  %447 = vmatprep.mubr.msk.bf16.mxu0 %vm569_vm1, %v568_v1  ;;  %s185_s7 = scalar_lea.vmem %s700_s0, %s427_s4 }
  0x16   : > { %v198_v4 = vld [vmem:[%s191_s30] sm:$0xff]  ;;  %v199_v5 = vld [vmem:[%s191_s30 + $0x8] sm:$0xff]  ;;  %v226_v12 = vand.u32 127, %v225_v11  ;;  %v312_v42 = vshrl.u32 %v225_v11, 7  ;;  %s337_s27 = scalar_lea.sflag [#allocation3], %s178_s9  ;;  %s505_s28 = scalar_lea.vmem %s662_s17, 128 }
  0x17   : > { %228 = vperm.xlu0 %495, %v198_v4   ;;  %v440_v6 = vld [vmem:[%s185_s7] sm:$0xff]   ;;  %p506_p11 = scmp.ne.s32.totalorder %s662_s17, %s505_s28  ;;  %s511_s30 = scalar_lea.vmem %s510_s16, 256 }
  0x18   : > { %v441_v7 = vunpack.c.l.bf16 %v440_v6  ;;  %v442_v8 = vunpack.c.h.bf16 %v440_v6  ;;  %v313_v47 = vadd.s32 8, %v312_v42  ;;  %v315_v48 = vadd.s32 %v314_v44, %v312_v42  ;;  %p513_p1 = scmp.lt.s32.totalorder %s511_s30, %s505_s28 }
  0x19   : > { %p507_p12 = pnand %p506_p11, %p629_p5 }
  0x1a   : > { %v203_v9 = vsel %vm202_vm0, %v441_v7, -inf  ;;  %v206_v10 = vsel %vm202_vm0, %v442_v8, -inf  ;;  %v316_v52 = vadd.s32 %v314_v44, %v313_v47  ;;  %vm317_vm4 = vcmp.lt.s32.totalorder %v315_v48, 20  ;;  %p514_p2 = por %p513_p1, %p512_p0 }
  0x1b   : > { %231 = vperm.xlu0 %495, %v199_v5   ;;  %204 = vmax.xlane.f32.xlu1 %v203_v9  ;;  %p508_p13 = pneg %p507_p12 }
  0x1c   : > { %vm318_vm5 = vcmp.lt.s32.totalorder %v316_v52, 20 }
  0x1d   : > { %p515_p3 = pnand %p514_p2, %p508_p13 }
  0x1f   : > { %207 = vmax.xlane.f32.xlu1 %v206_v10 }
  0x92   : > { %v229_v13 = vpop.permute.xlu0 %228 }
  0x93   : > { %vm233_vm2 = vcmp.eq.s32.totalorder %v226_v12, %v229_v13 }
  0x94   : > { %v430_v15 = vsel %vm233_vm2, 1.0, %v568_v1 }
  0x96   : > { %v232_v14 = vpop.permute.xlu0 %231 }
  0x97   : > { %vm234_vm3 = vcmp.eq.s32.totalorder %v226_v12, %v232_v14 }
  0x98   : > { %v431_v16 = vsel %vm234_vm3, 1.0, %v568_v1 }
  0x99   : > { %v239_v17 = vpack.c.bf16 %v431_v16, %v430_v15 }
  0x9b   : > { %448 = vmatmul.mubr.msk.bf16.vlgmr.msra.gmra.mxu0 %vm202_vm0, %v239_v17 }
  0xa4   : > { %v205_v18 = vpop.xlane.xlu1 %204 }
  0xa5   : > { %v209_v19 = vsub.f32 %v441_v7, %v205_v18 }
  0xa7   : > { %v211_v20 = vmul.f32 1.442695, %v209_v19 }
  0xa8   : > { %v208_v21 = vpop.xlane.xlu1 %207 }
  0xa9   : > { %497 = vpow2.f32 %v211_v20  ;;  %v210_v22 = vsub.f32 %v442_v8, %v208_v21 }
  0xab   : > { %v213_v23 = vmul.f32 1.442695, %v210_v22 }
  0xad   : > { %499 = vpow2.f32 %v213_v23 }
  0xb6   : > { %v498_v24 = vpop.eup %497 }
  0xb7   : > { %v215_v25 = vsel %vm202_vm0, %v498_v24, 0.0 }
  0xb8   : > { %216 = vadd.xlane.f32.xlu0 %v215_v25 }
  0xba   : > { %v500_v26 = vpop.eup %499 }
  0xbb   : > { %v218_v27 = vsel %vm202_vm0, %v500_v26, 0.0 }
  0xbc   : > { %219 = vadd.xlane.f32.xlu1 %v218_v27 }
 0x141   : > { %v217_v38 = vpop.xlane.xlu0 %216 }
 0x142   : > { %501 = vlog2.f32 %v217_v38 }
 0x145   : > { %v220_v39 = vpop.xlane.xlu1 %219 }
 0x146   : > { %503 = vlog2.f32 %v220_v39 }
 0x14f   : > { %v502_v40 = vpop.eup %501 }
 0x150   : > { %v222_v43 = vmul.f32 0.6931472, %v502_v40 }
 0x153   : > { %v504_v45 = vpop.eup %503 }
 0x154   : > { %v224_v50 = vmul.f32 0.6931472, %v504_v45 }
 0x15b   : > { %v285_v28 = vpop.f32.mrf.mxu0 }
 0x15c   : > { %v292_v29 = vmul.f32 %v285_v28, %v209_v19  ;;  %v300_v30 = vsel %vm202_vm0, %v285_v28, 0.0 }
 0x15d   : > { %v449_v31 = vpop.f32.mrf.mxu0  ;;  %301 = vadd.xlane.f32.xlu1 %v300_v30 }
 0x15e   : > { %v294_v33 = vsel %vm202_vm0, %v292_v29, 0.0 }
 0x15f   : > { %v288_v32 = vpop.f32.mrf.mxu0 }
 0x160   : > { %v293_v35 = vmul.f32 %v288_v32, %v210_v22  ;;  %v303_v36 = vsel %vm202_vm0, %v288_v32, 0.0 }
 0x161   : > { %v450_v34 = vpop.f32.mrf.mxu0  ;;  %295 = vadd.xlane.f32.xlu1 %v294_v33 }
 0x162   : > { %v297_v37 = vsel %vm202_vm0, %v293_v35, 0.0 }
 0x165   : > { %304 = vadd.xlane.f32.xlu1 %v303_v36 }
 0x169   : > { %298 = vadd.xlane.f32.xlu1 %v297_v37 }
 0x1e6   : > { %v302_v41 = vpop.xlane.xlu1 %301 }
 0x1e7   : > { %v306_v49 = vmul.f32 %v302_v41, %v222_v43 }
 0x1ea   : > { %v296_v46 = vpop.xlane.xlu1 %295 }
 0x1eb   : > { %v308_v53 = vsub.f32 %v306_v49, %v296_v46 }
 0x1ed   : > { %v319_v56 = vsel %vm317_vm4, %v308_v53, 0.0 }
 0x1ee   : > { %v305_v51 = vpop.xlane.xlu1 %304  ;;  %v322_v59 = vsel %vm321_vm6, %v319_v56, 0.0 }
 0x1ef   : > { %v307_v54 = vmul.f32 %v305_v51, %v224_v50 }
 0x1f2   : > { %v299_v55 = vpop.xlane.xlu1 %298 }
 0x1f3   : > { %v309_v57 = vsub.f32 %v307_v54, %v299_v55 }
 0x1f5   : > { %v320_v58 = vsel %vm318_vm5, %v309_v57, 0.0 }
 0x1f6   : > { %v323_v60 = vsel %vm321_vm6, %v320_v58, 0.0 }
 0x1f7   : > { %v324_v61 = vadd.f32 %v323_v60, %v322_v59 }
 0x1f9   : > { %325 = vadd.xlane.f32.xlu1 %v324_v61 }
 0x282   : > { %v326_v62 = vpop.xlane.xlu1 %325 }
 0x283   : > { %v327_v63 = vrot.slane %v326_v62, 4 }
 0x285   : > { %v328_v0 = vadd.f32 %v327_v63, %v326_v62 }
 0x287   : > { %v329_v1 = vrot.slane %v328_v0, 2 }
 0x289   : > { %v330_v2 = vadd.f32 %v329_v1, %v328_v0 }
 0x28b   : > { %v331_v3 = vrot.slane %v330_v2, 1 }
 0x28d   : > { %v332_v4 = vadd.f32 %v331_v3, %v330_v2 }
 0x28f   : > { %451 = vpush %v332_v4 }
 0x2c0   : > { %s452_s20 = spop %451 }
 0x2c1   : > { %v334_v5 = vstv %s452_s20 }
 0x2c2   : > { %335 = vst [vmem:[%s180_s11] sm:$0xff] %v334_v5 }
 0x2c3   : > { %518 = shalt.err (!%p515_p3)
}
 0x2c4   : > { %s519_s4 = scalar_lea.hbm %s348_s26, 128  ;;  %s523_s7 = scalar_lea.hbm %s703_s3, 256 }
 0x2c5   : > { %p520_p4 = scmp.ne.s32.totalorder %s348_s26, %s519_s4  ;;  %p524_p9 = scmp.lt.s32.totalorder %s348_s26, %s703_s3 }
 0x2c6   : > { %p525_p10 = scmp.lt.s32.totalorder %s523_s7, %s519_s4 }
 0x2c7   : > { %p521_p7 = pnand %p520_p4, %p629_p5 }
 0x2c8   : > { %p526_p11 = por %p525_p10, %p524_p9 }
 0x2c9   : > { %p522_p8 = pneg %p521_p7 }
 0x2cb   : > { %p527_p12 = pnand %p526_p11, %p522_p8 }
 0x2cd   : > { %530 = shalt.err (!%p527_p12)
}
 0x2ce   : > { %453 = dma.vmem_to_hbm [thread:$0]  (%p629_p5), %s662_s17, 128, %s348_s26, %s337_s27  }
 0x2cf PF: > { %p459_p13 = scmp.ge.s32.totalorder %s565_s15, 2  ;;  %s362_s10 = sand.u32 1, %s553_s12  }
 0x2d0   : > { %s363_s11 = scalar_lea.sflag [#allocation3], %s362_s10 }
 0x2d1   : > { %p456_p0 = pnand %p459_p13, %p633_p6 }
 0x2d3   : > { %p457_p1 = pneg %p456_p0 }
 0x2d5   : > { %548 = dma.done.wait (%p457_p1), %s363_s11, 128  }
 0x2d6   : > { %550 = vsyncadd (%p457_p1), %s363_s11, 4294967168  ;;  %p13_p2 = scmp.ge.s32.totalorder %s616_s18, 4   ;;  %s706_s12 = smov %s557_s13 }
 0x2d7   : > { %s707_s13 = smov %s561_s14  ;;  %s708_s14 = smov %s627_s21 }
 0x2d8   : > { %s709_s15 = smov %s616_s18  ;;  %15 = sbr.rel (!%p13_p2) target bundleno = 3 (0x3), region = 70 }
 0x2dd   :  { %368 = vsyncpa [#allocation3], 1 }
 0x2de   :  { %370 = vsyncpa [#allocation3 + $0x1], 1 }

</bundles_post_ra>
